<compile_context>
chip_gen: v7x
topology: tpu7x:2x2x1
jax: 0.10.0
libtpu: 0.0.40
codegen_flags: <defaults>
</compile_context>

<pallas_src>
import jax
import jax.numpy as jnp
from jax.experimental import pallas as pl
from jax.experimental.pallas import tpu as pltpu


def _round_up(x, m):
    return (x + m - 1) // m * m


def _gan_kernel(z_ref, w_ref, b_ref, o_ref):
    # z_ref: (TM, z_dim) bf16   w_ref: (z_dim, TN) bf16
    # b_ref: (1, TN)     f32    o_ref: (TM, TN)    out_dtype
    # MXU matmul with f32 accumulation, VPU bias-add, EUP tanh (all f32 so the
    # same kernel is a fast path on v5e as well); cast only on the store.
    logits = jnp.dot(z_ref[...], w_ref[...],
                     preferred_element_type=jnp.float32) + b_ref[...]
    o_ref[...] = jnp.tanh(logits).astype(o_ref.dtype)


def gan_forward(z, w, b, img_height, img_width, *,
                out_dtype=jnp.bfloat16, tm=None, tn=None):
    """z: (N, z_dim) -> images (N, img_height, img_width) in `out_dtype`."""
    n, z_dim = z.shape
    hw = img_height * img_width
    assert w.shape == (z_dim, hw)
    assert b.shape == (hw,)

    # Pad to hardware-friendly extents: sublane multiple (8) on N,
    # lane multiple (128) on HW.
    n_pad = _round_up(n, 8)
    hw_pad = _round_up(hw, 128)

    # Tile sizes: lane-dense multiples of 128 on the output axis; sized so the
    # double-buffered (z + w + b + out) tile set is well inside v7x's 64 MiB
    # VMEM even for large GAN heads (z_dim<=512: < ~3 MiB per buffer set).
    if tm is None:
        tm = min(n_pad, 256)
    if tn is None:
        tn = min(hw_pad, 512)
    n_pad = _round_up(n_pad, tm)
    hw_pad = _round_up(hw_pad, tn)

    # bf16 HBM-facing tensors halve weight reads and output writeback.
    # Zero-padded rows/cols are sliced off below (tanh(0)=0, so they are
    # harmless and cheap).
    z_p = jnp.zeros((n_pad, z_dim), jnp.bfloat16).at[:n, :].set(
        z.astype(jnp.bfloat16))
    w_p = jnp.zeros((z_dim, hw_pad), jnp.bfloat16).at[:, :hw].set(
        w.astype(jnp.bfloat16))
    b_p = jnp.zeros((1, hw_pad), jnp.float32).at[0, :hw].set(
        b.astype(jnp.float32))

    grid = (n_pad // tm, hw_pad // tn)
    out_itemsize = jnp.dtype(out_dtype).itemsize
    bytes_accessed = (n_pad * z_dim * 2          # z (bf16)
                      + z_dim * hw_pad * 2       # W (bf16)
                      + hw_pad * 4               # b (f32)
                      + n_pad * hw_pad * out_itemsize)

    flat = pl.pallas_call(
        _gan_kernel,
        out_shape=jax.ShapeDtypeStruct((n_pad, hw_pad), out_dtype),
        grid=grid,
        in_specs=[
            pl.BlockSpec((tm, z_dim), lambda i, j: (i, 0)),   # z tile
            pl.BlockSpec((z_dim, tn), lambda i, j: (0, j)),   # W tile
            pl.BlockSpec((1, tn), lambda i, j: (0, j)),       # bias row tile
        ],
        out_specs=pl.BlockSpec((tm, tn), lambda i, j: (i, j)),
        compiler_params=pltpu.CompilerParams(
            dimension_semantics=("parallel", "parallel")),
        cost_estimate=pl.CostEstimate(
            flops=2 * n_pad * z_dim * hw_pad,
            transcendentals=n_pad * hw_pad,
            bytes_accessed=bytes_accessed),
    )(z_p, w_p, b_p)

    # Slice off padding and present the (N, H, W) image layout.
    return flat[:n, :hw].reshape(n, img_height, img_width)


if __name__ == "__main__":
    # Small, deterministic example shapes consistent with the module contract.
    # N=16 / 32x32 images keep the demo tiny while still exercising the 2-D
    # grid (HW=1024 -> two lane tiles of 512).
    N, Z_DIM = 16, 32
    IMG_H, IMG_W = 32, 32

    key = jax.random.PRNGKey(0)
    k_z, k_w, k_b = jax.random.split(key, 3)

    z = jax.random.normal(k_z, (N, Z_DIM), dtype=jnp.float32)
    # Deterministic "generator" parameters (synthetic init, no checkpoint load).
    w = jax.random.normal(k_w, (Z_DIM, IMG_H * IMG_W), dtype=jnp.float32) * 0.05
    b = jax.random.normal(k_b, (IMG_H * IMG_W,), dtype=jnp.float32) * 0.01

    imgs = gan_forward(z, w, b, IMG_H, IMG_W)
    jax.block_until_ready(imgs)

    # Cross-check against plain-JAX reference (bf16 weight/output path ->
    # looser tolerance than the previous f32-everywhere version).
    ref = jnp.tanh(z @ w + b).reshape(N, IMG_H, IMG_W)
    assert imgs.shape == (N, IMG_H, IMG_W)
    assert imgs.dtype == jnp.bfloat16
    assert jnp.allclose(imgs.astype(jnp.float32), ref, atol=2e-2, rtol=2e-2)

    print("KERNEL_OK")
</pallas_src>

<mosaic_0001>
module attributes {stable_mosaic.version = 11 : i64} {
  func.func @_gan_kernel(%arg0: i32, %arg1: i32, %arg2: memref<16x32xbf16, #tpu.memory_space<vmem>>, %arg3: memref<32x512xbf16, #tpu.memory_space<vmem>>, %arg4: memref<1x512xf32, #tpu.memory_space<vmem>>, %arg5: memref<16x512xbf16, #tpu.memory_space<vmem>>) attributes {dimension_semantics = [#tpu.dimension_semantics<parallel>, #tpu.dimension_semantics<parallel>], iteration_bounds = array<i64: 1, 2>, scalar_prefetch = 0 : i64, scratch_operands = 0 : i64, tpu.core_type = #tpu.core_type<tc>, window_params = [{transform_indices = @transform_0, window_bounds = array<i64: 16, 32>}, {transform_indices = @transform_1, window_bounds = array<i64: 32, 512>}, {transform_indices = @transform_2, window_bounds = array<i64: 1, 512>}, {transform_indices = @transform_3, window_bounds = array<i64: 16, 512>}]} {
    %c0 = arith.constant 0 : index
    %c0_0 = arith.constant 0 : index
    %0 = vector.load %arg2[%c0, %c0_0] : memref<16x32xbf16, #tpu.memory_space<vmem>>, vector<16x32xbf16>
    %c0_1 = arith.constant 0 : index
    %c0_2 = arith.constant 0 : index
    %1 = vector.load %arg3[%c0_1, %c0_2] : memref<32x512xbf16, #tpu.memory_space<vmem>>, vector<32x512xbf16>
    %cst = arith.constant dense<0.000000e+00> : vector<16x512xf32>
    %2 = tpu.matmul %0, %1, %cst {dimension_numbers = #tpu.dot_dimension_numbers<[1], [0], [0], [1], [0, 0, 1, 1], [], []>} : vector<16x32xbf16>, vector<32x512xbf16>, vector<16x512xf32> -> vector<16x512xf32>
    %c0_3 = arith.constant 0 : index
    %c0_4 = arith.constant 0 : index
    %3 = vector.load %arg4[%c0_3, %c0_4] : memref<1x512xf32, #tpu.memory_space<vmem>>, vector<1x512xf32>
    %4 = vector.broadcast %3 : vector<1x512xf32> to vector<16x512xf32>
    %5 = arith.addf %2, %4 : vector<16x512xf32>
    %6 = math.tanh %5 : vector<16x512xf32>
    %7 = arith.truncf %6 : vector<16x512xf32> to vector<16x512xbf16>
    %c0_5 = arith.constant 0 : index
    %c0_6 = arith.constant 0 : index
    %8 = vector.load %arg5[%c0_5, %c0_6] : memref<16x512xbf16, #tpu.memory_space<vmem>>, vector<16x512xbf16>
    tpu.vector_store %arg5[%c0_5, %c0_6], %7 {strides = array<i32>} : memref<16x512xbf16, #tpu.memory_space<vmem>>, vector<16x512xbf16>,
    return
  }
  func.func @transform_0(%arg0: i32, %arg1: i32) -> (i32, i32) {
    %c0_i32 = arith.constant 0 : i32
    %c0_i32_0 = arith.constant 0 : i32
    return %arg0, %c0_i32 : i32, i32
  }
  func.func @transform_1(%arg0: i32, %arg1: i32) -> (i32, i32) {
    %c0_i32 = arith.constant 0 : i32
    %c0_i32_0 = arith.constant 0 : i32
    return %c0_i32, %arg1 : i32, i32
  }
  func.func @transform_2(%arg0: i32, %arg1: i32) -> (i32, i32) {
    %c0_i32 = arith.constant 0 : i32
    %c0_i32_0 = arith.constant 0 : i32
    return %c0_i32, %arg1 : i32, i32
  }
  func.func @transform_3(%arg0: i32, %arg1: i32) -> (i32, i32) {
    %c0_i32 = arith.constant 0 : i32
    return %arg0, %arg1 : i32, i32
  }
}

</mosaic_0001>

<bundles_post_ra>
// kernel: tpu_custom_call.1
= control target key start
LH: loop header
LB: loop body
LE: loop exit
PB: predicated region body
PF: predicated region fallthrough
CT: control target
= control target key end

     0   :  { %s1232_s0 = inlined_call_operand.hbm [shape: bf16[16,32], index: 0, kind: input, shape index: {}]   ;;  %s1233_s1 = inlined_call_operand.hbm [shape: bf16[32,1024], index: 1, kind: input, shape index: {}]   ;;  %s1234_s2 = inlined_call_operand.hbm [shape: f32[1,1024], index: 2, kind: input, shape index: {}]   ;;  %s1235_s3 = inlined_call_operand.hbm [shape: bf16[16,1024], index: 3, kind: output, shape index: {}]  }
   0x1   :  { %1244 = sst [smem:[#allocation13_spill]] %s1233_s1 }
   0x2   :  { %8 = vsyncpa [#allocation3], 0 }
   0x3   :  { %9 = vsyncpa [#allocation6], 0 }
   0x4   :  { %11 = vsyncpa [#allocation6 + $0x1], 0 }
   0x5   :  { %12 = vsyncpa [#allocation4], 0 }
   0x6   :  { %14 = vsyncpa [#allocation4 + $0x1], 0  ;;  %s973_s12 = smov 0   ;;  %s975_s13 = smov 0  }
   0x7   :  { %s977_s14 = smov 0   ;;  %s979_s15 = smov 0  }
   0x8   :  { %s981_s16 = smov 0   ;;  %s983_s17 = smov 0  }
   0x9 LB: > { %s29_s18 = sadd.s32 1, %s934_s16  ;;  %s65_s19 = sadd.s32 1, %s926_s14  ;;  %s938_s17 = sphi %s983_s17, %s20_s17   ;;  %s934_s16 = sphi %s981_s16, %s1268_s16   ;;  %s930_s15 = sphi %s979_s15, %s1267_s15   ;;  %s926_s14 = sphi %s977_s14, %s1266_s14   ;;  %s922_s13 = sphi %s975_s13, %s1265_s13   ;;  %s918_s12 = sphi %s973_s12, %s1264_s12  }
   0xa   : > { %p30_p0 = scmp.ge.s32.totalorder %s29_s18, 2  ;;  %p72_p1 = scmp.ne.s32.totalorder %s926_s14, %s922_s13 }
   0xb   : > { %p73_p2 = scmp.eq.s32.totalorder %s938_s17, 0  ;;  %p674_p5 = scmp.lt.s32.totalorder %s938_s17, 2 }
   0xc   : > { %s1270_s18 = smov (%p30_p0, %s29_s18), 0  ;;  %s172_s21 = sand.u32 1, %s938_s17  }
   0xd   : > { %1245 = sst [smem:[#allocation12_spill]] %s1270_s18  ;;  %p74_p4 = por %p73_p2, %p72_p1 }
   0xe   : > { %s62_s20 = ssub.s32 %s934_s16, %s1270_s18  ;;  %s174_s22 = sand.u32 1, %s926_s14  }
   0xf   : > { %p63_p6 = scmp.eq.s32.totalorder %s62_s20, 0  ;;  %s641_s23 = sshll.u32 %s934_s16, 8 }
  0x10   : > { %s610_s25 = sshll.u32 %s174_s22, 6  ;;  %s1246_s1 = sld [smem:[#allocation13_spill]] }
  0x11   : > { %s1021_s24 = scalar_select %p63_p6, %s926_s14, %s65_s19  }
  0x12   : > { %p1030_p7 = pnand %p674_p5, %p74_p4  ;;  %s176_s30 = scalar_lea.vmem [#allocation5], %s610_s25 }
  0x13   : > { %s183_s4 = sshll.u32 %s176_s30, 4  ;;  %s1036_s5 = scalar_lea.sflag [#allocation6], %s172_s21  ;;  %s1034_s4 = int_to_ptr.vmem [resolvable:$true] %s183_s4 }
  0x14   : > { %s1247_s29 = scalar_select %p1030_p7, 1, 0 }
  0x15   : > { %p1238_p9 = pneg %p1030_p7 }
  0x16   : > { %s1028_s28 = scalar_lea.hbm %s1246_s1, %s641_s23  ;;  %s769_s9 = scalar_lea.hbm %s1246_s1, 2048 }
  0x17   : > { %s764_s6 = scalar_lea.hbm %s1028_s28, 1024  ;;  %p770_p12 = scmp.lt.u32.totalorder %s1028_s28, %s1246_s1 }
  0x18   : > { %p765_p8 = scmp.ne.s32.totalorder %s1028_s28, %s764_s6  ;;  %p771_p13 = scmp.lt.u32.totalorder %s769_s9, %s764_s6 }
  0x19   : > { %p773_p2 = scmp.lt.u32.totalorder %s764_s6, %s1028_s28 }
  0x1a   : > { %p767_p10 = pnand %p1238_p9, %p765_p8  ;;  %p772_p0 = por %p771_p13, %p770_p12 }
  0x1c   : > { %p768_p11 = pneg %p767_p10  ;;  %p774_p4 = por %p773_p2, %p772_p0 }
  0x1e   : > { %p775_p5 = pnand %p774_p4, %p768_p11 }
  0x20   : > { %778 = shalt.err (!%p775_p5)
}
  0x21   : > { %s779_s19 = scalar_lea.vmem %s1034_s4, 1024  ;;  %s940_s20 = smov [#allocation5]  }
  0x22   : > { %p780_p6 = scmp.ne.s32.totalorder %s1034_s4, %s779_s19  ;;  %s784_s21 = sshll.u32 %s940_s20, 4  ;;  %s785_s21 = int_to_ptr.vmem [resolvable:$false] %s784_s21 }
  0x23   : > { %s786_s23 = scalar_lea.vmem %s785_s21, 2048  ;;  %p787_p3 = scmp.lt.s32.totalorder %s1034_s4, %s785_s21 }
  0x24   : > { %p782_p8 = pnand %p780_p6, %p1238_p9  ;;  %p788_p12 = scmp.lt.s32.totalorder %s786_s23, %s779_s19 }
  0x26   : > { %p783_p10 = pneg %p782_p8  ;;  %p789_p13 = por %p788_p12, %p787_p3 }
  0x28   : > { %p790_p0 = pnand %p789_p13, %p783_p10 }
  0x2a   : > { %793 = shalt.err (!%p790_p0)
}
  0x2b   : > { %s941_s25 = smov 512   ;;  %s942_s26 = smov 256  }
  0x2c   : > { %s943_s27 = smov 16   ;;  %s1065_s30 = sadd.s32 4294967295, %s938_s17  }
  0x2d   : > { %665 = dma.hbm_to_vmem [thread:$0]  (!%p1030_p7), %s1028_s28, 1024, %s1034_s4, %s1036_s5, %s941_s25, %s942_s26, %s943_s27  }
  0x2e   : > { %s606_s6 = sadd.s32 4294967294, %s938_s17   ;;  %p78_p3 = scmp.ne.s32.totalorder %s922_s13, %s918_s12 }
  0x2f   : > { %p1237_p11 = scmp.eq.s32.totalorder %s1065_s30, 0  ;;  %p130_p2 = scmp.eq.s32.totalorder %s1065_s30, 1 }
  0x30   : > { %p136_p4 = scmp.eq.s32.totalorder %s606_s6, 1  ;;  %p607_p6 = scmp.ge.s32.totalorder %s938_s17, 1 }
  0x31   : > { %p1074_p5 = por %p1237_p11, %p78_p3  ;;  %p1082_p8 = por %p130_p2, %p72_p1 }
  0x32   : > { %p1086_p10 = por %p136_p4, %p78_p3  ;;  %p143_p12 = scmp.lt.s32.totalorder %s938_s17, 3 }
  0x33   : > { %s1248_s7 = scalar_select %p1074_p5, 1, 0 }
  0x34   : > { %s1249_s28 = scalar_select %p1082_p8, 1, 0 }
  0x35   : > { %s1250_s4 = scalar_select %p1086_p10, 1, 0 }
  0x36   : > { %p1091_p13 = pnand %p607_p6, %p143_p12  ;;  %s944_s9 = smov [#allocation2]  }
  0x37   : > { %s158_s10 = sshll.u32 %s944_s9, 4  ;;  %s613_s11 = sshll.u32 %s174_s22, 2  ;;  %s1095_s10 = int_to_ptr.vmem [resolvable:$true] %s158_s10 }
  0x38   : > { %s1251_s8 = scalar_select %p1091_p13, 1, 0 }
  0x39   : > { %p658_p0 = pneg %p1091_p13  ;;  %s642_s19 = sshll.u32 %s934_s16, 6 }
  0x3a   : > { %s1111_s25 = scalar_lea.hbm %s1234_s2, %s642_s19  ;;  %s197_s26 = scalar_lea.vmem [#allocation7], %s613_s11 }
  0x3b   : > { %p1104_p1 = pnand %p658_p0, %p1237_p11  ;;  %s205_s27 = sshll.u32 %s197_s26, 4  ;;  %s1113_s27 = int_to_ptr.vmem [resolvable:$true] %s205_s27 }
  0x3c   : > { %s794_s22 = scalar_lea.hbm %s1232_s0, 128 }
  0x3d   : > { %p795_p3 = scmp.ne.s32.totalorder %s1232_s0, %s794_s22  ;;  %p796_p2 = pneg %p1104_p1 }
  0x3e   : > { %p801_p12 = scmp.lt.u32.totalorder %s794_s22, %s1232_s0 }
  0x3f   : > { %p797_p4 = pnand %p796_p2, %p795_p3 }
  0x41   : > { %p798_p6 = pneg %p797_p4 }
  0x43   : > { %p803_p0 = pnand %p801_p12, %p798_p6 }
  0x45   : > { %806 = shalt.err (!%p803_p0)
}
  0x46   : > { %s807_s11 = scalar_lea.vmem %s1095_s10, 128  ;;  %p815_p8 = scmp.lt.s32.totalorder %s1095_s10, %s1095_s10 }
  0x47   : > { %p808_p11 = scmp.ne.s32.totalorder %s1095_s10, %s807_s11  ;;  %p816_p5 = scmp.lt.s32.totalorder %s807_s11, %s807_s11 }
  0x49   : > { %p810_p9 = pnand %p808_p11, %p796_p2  ;;  %p817_p13 = por %p816_p5, %p815_p8 }
  0x4b   : > { %p811_p10 = pneg %p810_p9 }
  0x4d   : > { %p818_p7 = pnand %p817_p13, %p811_p10 }
  0x4f   : > { %821 = shalt.err (!%p818_p7)
}
  0x50   : > { %s945_s1 = smov 64   ;;  %s946_s18 = smov 4  }
  0x51   : > { %661 = dma.hbm_to_vmem [thread:$0]  (!%p1104_p1), %s1232_s0, 128, %s1095_s10, [#allocation3], %s945_s1, %s945_s1, %s946_s18  }
  0x52   : > { %s822_s6 = scalar_lea.hbm %s1111_s25, 64  ;;  %p1253_p11 = scmp.ne.s32.totalorder %s1247_s29, 0 }
  0x53   : > { %p823_p9 = scmp.ne.s32.totalorder %s1111_s25, %s822_s6  ;;  %s827_s21 = scalar_lea.hbm %s1234_s2, 128 }
  0x54   : > { %p1254_p5 = pneg %p1253_p11  ;;  %p828_p10 = scmp.lt.u32.totalorder %s1111_s25, %s1234_s2 }
  0x55   : > { %p829_p13 = scmp.lt.u32.totalorder %s827_s21, %s822_s6  ;;  %p831_p2 = scmp.lt.u32.totalorder %s822_s6, %s1111_s25 }
  0x56   : > { %p825_p8 = pnand %p823_p9, %p1254_p5 }
  0x57   : > { %p830_p3 = por %p829_p13, %p828_p10 }
  0x58   : > { %p826_p7 = pneg %p825_p8 }
  0x59   : > { %p832_p4 = por %p831_p2, %p830_p3 }
  0x5b   : > { %p833_p6 = pnand %p832_p4, %p826_p7 }
  0x5d   : > { %836 = shalt.err (!%p833_p6)
}
  0x5e   : > { %s837_s10 = scalar_lea.vmem %s1113_s27, 64  ;;  %p1255_p12 = pmov %p1254_p5 }
  0x5f   : > { %p838_p1 = scmp.ne.s32.totalorder %s1113_s27, %s837_s10  ;;  %s947_s20 = smov [#allocation7]  }
  0x60   : > { %s842_s1 = sshll.u32 %s947_s20, 4  ;;  %s843_s1 = int_to_ptr.vmem [resolvable:$false] %s842_s1 }
  0x61   : > { %p840_p0 = pnand %p838_p1, %p1255_p12  ;;  %s844_s18 = scalar_lea.vmem %s843_s1, 128 }
  0x62   : > { %p845_p5 = scmp.lt.s32.totalorder %s1113_s27, %s843_s1  ;;  %p846_p8 = scmp.lt.s32.totalorder %s844_s18, %s837_s10 }
  0x63   : > { %p841_p9 = pneg %p840_p0 }
  0x64   : > { %p847_p10 = por %p846_p8, %p845_p5 }
  0x66   : > { %p848_p13 = pnand %p847_p10, %p841_p9 }
  0x68   : > { %851 = shalt.err (!%p848_p13)
}
  0x69   : > { %668 = dma.hbm_to_vmem [thread:$0]  (!%p1253_p11), %s1111_s25, 64, %s1113_s27, %s1036_s5  }
  0x6a   : > { %p1256_p7 = scmp.ne.s32.totalorder %s1251_s8, 0 }
  0x6b   : > { %p1257_p3 = scmp.eq.s32.totalorder (!%p1256_p7), %s1065_s30, 0 }
  0x6c   : > { %214 = sbr.rel (%p1256_p7) target bundleno = 381 (0x17d), region = 32 }
  0x73   : > { %905 = dma.done.wait (%p1257_p3), [#allocation3], 128   ;;  %p1258_p2 = pmov %p1257_p3 }
  0x74   : > { %s220_s19 = sand.u32 1, %s1065_s30   ;;  %s1168_s26 = sand.u32 1, %s922_s13  }
  0x75   : > { %907 = vsyncadd (%p1258_p2), [#allocation3], 4294967168  ;;  %s618_s29 = sshll.u32 %s1168_s26, 6  ;;  %s221_s6 = scalar_lea.sflag [#allocation6], %s220_s19 }
  0x76   : > { %s224_s9 = scalar_lea.vmem [#allocation5], %s618_s29  ;;  %p1259_p11 = scmp.ne.s32.totalorder %s1248_s7, 0 }
  0x78   : > { %909 = dma.done.wait (%p1259_p11), %s221_s6, 1088  }
  0x79   : > { %911 = vsyncadd (%p1259_p11), %s221_s6, 4294966208  ;;  %v948_v0 = vmov 0   ;;  %v735_v1 = vld [vmem:[%s224_s9 + $0x4] ss:$16 sps:$4 sm:$0xff]   ;;  %v737_v2 = vld [vmem:[%s224_s9 + $0xc] ss:$16 sps:$4 sm:$0xff]   ;;  %v279_v10 = vlaneseq }
  0x7a   : > { %380 = vmatprep.mubr.bf16.mxu0 %v948_v0  ;;  %423 = vmatprep.mubr.bf16.mxu1 %v948_v0  ;;  %v739_v3 = vld [vmem:[%s224_s9] ss:$16 sps:$4 sm:$0xff]   ;;  %v740_v4 = vld [vmem:[%s224_s9 + $0x8] ss:$16 sps:$4 sm:$0xff]   ;;  %v741_v5 = vld [vmem:[%s224_s9 + $0x24] ss:$16 sps:$4 sm:$0xff]  }
  0x7b   : > { %348 = vmatprep.subr.bf16.mxu0 %v735_v1  ;;  %391 = vmatprep.subr.bf16.mxu1 %v737_v2  ;;  %v743_v6 = vld [vmem:[%s224_s9 + $0x2c] ss:$16 sps:$4 sm:$0xff]   ;;  %v745_v7 = vld [vmem:[%s224_s9 + $0x20] ss:$16 sps:$4 sm:$0xff]   ;;  %v746_v8 = vld [vmem:[%s224_s9 + $0x28] ss:$16 sps:$4 sm:$0xff]  }
  0x7c   : > { %349 = vmatpush1.bf16.msra.mxu0 %v739_v3  ;;  %392 = vmatpush1.bf16.msra.mxu1 %v740_v4  ;;  %v747_v9 = vld [vmem:[#allocation2] sm:$0xff]   ;;  %vm344_vm0 = vcmask 261120   ;;  %s619_s5 = sshll.u32 %s1168_s26, 2  ;;  %v280_v11 = vshrl.u32 %v279_v10, 7  ;;  %s620_s7 = sshll.u32 %s1168_s26, 5 }
  0x7d   : > { %350 = vmatprep.subr.bf16.mxu0 %v741_v5  ;;  %393 = vmatprep.subr.bf16.mxu1 %v743_v6  ;;  %s233_s30 = scalar_lea.vmem [#allocation7], %s619_s5  ;;  %s260_s8 = scalar_lea.vmem [#allocation8], %s620_s7 }
  0x7e   : > { %v281_v12 = vsub.s32 0, %v280_v11  ;;  %v289_v13 = vsub.s32 2, %v280_v11  ;;  %v277_v14 = vld [vmem:[%s233_s30] sm:$0xf]  ;;  %v285_v15 = vsub.s32 1, %v280_v11  ;;  %v293_v16 = vsub.s32 3, %v280_v11 }
  0x7f   : > { %s487_s25 = sshll.u32 %s260_s8, 4  ;;  %s647_s27 = sshll.u32 %s930_s15, 8  ;;  %s1178_s25 = int_to_ptr.vmem [resolvable:$true] %s487_s25 }
  0x80   : > { %351 = vmatpush1.bf16.msra.mxu0 %v745_v7  ;;  %394 = vmatpush1.bf16.msra.mxu1 %v746_v8  ;;  %v282_v17 = vrot.slane %v277_v14, %v281_v12  ;;  %v290_v18 = vrot.slane %v277_v14, %v289_v13  ;;  %v286_v19 = vrot.slane %v277_v14, %v285_v15  ;;  %s1183_s23 = scalar_lea.hbm %s1235_s3, %s647_s27  ;;  %s471_s15 = scalar_lea.sflag [#allocation4], %s1168_s26 }
  0x81   : > { %v294_v20 = vrot.slane %v277_v14, %v293_v16  ;;  %s852_s11 = scalar_lea.vmem %s1178_s25, 512  ;;  %p1260_p6 = scmp.ne.s32.totalorder %s1249_s28, 0 }
  0x82   : > { %p853_p4 = scmp.ne.s32.totalorder %s1178_s25, %s852_s11  ;;  %s949_s10 = smov [#allocation8]  }
  0x83   : > { %630 = vmatmul.mubr.msk.bf16.vlgmr.msra.gmra.mrb[0].mxu0 %vm344_vm0, %v747_v9  ;;  %631 = vmatmul.mubr.msk.bf16.vlgmr.msra.gmra.mrb[0].mxu1 %vm344_vm0, %v747_v9  ;;  %s856_s20 = sshll.u32 %s949_s10, 4  ;;  %s857_s20 = int_to_ptr.vmem [resolvable:$false] %s856_s20 }
  0x84   : > { %p854_p1 = pnand %p853_p4, %p1260_p6  ;;  %s858_s1 = scalar_lea.vmem %s857_s20, 1024 }
  0x85   : > { %p859_p0 = scmp.lt.s32.totalorder %s1178_s25, %s857_s20  ;;  %p860_p9 = scmp.lt.s32.totalorder %s858_s1, %s852_s11 }
  0x86   : > { %p855_p12 = pneg %p854_p1 }
  0x87   : > { %p861_p5 = por %p860_p9, %p859_p0 }
  0x89   : > { %p862_p8 = pnand %p861_p5, %p855_p12 }
 0x156   : > { %v382_v21 = vpop.f32.mrb[0].mxu0  ;;  %v425_v22 = vpop.f32.mrb[0].mxu1 }
 0x157   : > { %v383_v23 = vadd.f32 %v382_v21, %v282_v17  ;;  %v426_v24 = vadd.f32 %v425_v22, %v290_v18  ;;  %v384_v25 = vpop.f32.mrb[1].mxu0  ;;  %v427_v26 = vpop.f32.mrb[1].mxu1 }
 0x158   : > { %v385_v27 = vadd.f32 %v384_v25, %v286_v19  ;;  %v428_v28 = vadd.f32 %v427_v26, %v294_v20  ;;  %v386_v29 = vpop.f32.mrb[2].mxu0  ;;  %v429_v30 = vpop.f32.mrb[2].mxu1 }
 0x159   : > { %748 = vtanh.f32 %v383_v23  ;;  %v387_v31 = vadd.f32 %v386_v29, %v282_v17  ;;  %v388_v32 = vpop.f32.mrb[3].mxu0  ;;  %v431_v33 = vpop.f32.mrb[3].mxu1  ;;  %v430_v34 = vadd.f32 %v429_v30, %v290_v18 }
 0x15a   : > { %750 = vtanh.f32 %v426_v24  ;;  %v389_v35 = vadd.f32 %v388_v32, %v286_v19  ;;  %v432_v36 = vadd.f32 %v431_v33, %v294_v20 }
 0x15b   : > { %752 = vtanh.f32 %v385_v27 }
 0x15c   : > { %754 = vtanh.f32 %v428_v28 }
 0x15d   : > { %756 = vtanh.f32 %v387_v31 }
 0x15e   : > { %758 = vtanh.f32 %v430_v34 }
 0x15f   : > { %760 = vtanh.f32 %v389_v35 }
 0x160   : > { %762 = vtanh.f32 %v432_v36 }
 0x163   : > { %v749_v37 = vpop.eup %748 }
 0x164   : > { %v751_v38 = vpop.eup %750 }
 0x165   : > { %v753_v39 = vpop.eup %752 }
 0x166   : > { %v755_v40 = vpop.eup %754  ;;  %v643_v41 = vpack.c.bf16 %v753_v39, %v749_v37 }
 0x167   : > { %v757_v42 = vpop.eup %756  ;;  %v644_v43 = vpack.c.bf16 %v755_v40, %v751_v38 }
 0x168   : > { %v759_v44 = vpop.eup %758  ;;  %466 = vst [vmem:[%s260_s8] sm:$0xff] %v643_v41 }
 0x169   : > { %v761_v45 = vpop.eup %760  ;;  %467 = vst [vmem:[%s260_s8 + $0x8] sm:$0xff] %v644_v43 }
 0x16a   : > { %v763_v46 = vpop.eup %762  ;;  %v645_v47 = vpack.c.bf16 %v761_v45, %v757_v42 }
 0x16b   : > { %v646_v48 = vpack.c.bf16 %v763_v46, %v759_v44 }
 0x16c   : > { %468 = vst [vmem:[%s260_s8 + $0x10] sm:$0xff] %v645_v47 }
 0x16d   : > { %469 = vst [vmem:[%s260_s8 + $0x18] sm:$0xff] %v646_v48 }
 0x16e   : > { %865 = shalt.err (!%p862_p8)
}
 0x16f   : > { %s866_s18 = scalar_lea.hbm %s1183_s23, 512  ;;  %s870_s6 = scalar_lea.hbm %s1235_s3, 1024 }
 0x170   : > { %p867_p10 = scmp.ne.s32.totalorder %s1183_s23, %s866_s18  ;;  %p871_p3 = scmp.lt.u32.totalorder %s1183_s23, %s1235_s3 }
 0x171   : > { %p872_p2 = scmp.lt.u32.totalorder %s870_s6, %s866_s18  ;;  %p874_p4 = scmp.lt.u32.totalorder %s866_s18, %s1183_s23 }
 0x172   : > { %p868_p13 = pnand %p867_p10, %p1260_p6 }
 0x173   : > { %p873_p11 = por %p872_p2, %p871_p3 }
 0x174   : > { %p869_p7 = pneg %p868_p13 }
 0x175   : > { %p875_p1 = por %p874_p4, %p873_p11 }
 0x177   : > { %p876_p12 = pnand %p875_p1, %p869_p7 }
 0x179   : > { %879 = shalt.err (!%p876_p12)
}
 0x17a   : > { %s950_s30 = smov 256   ;;  %s951_s7 = smov 512  }
 0x17b   : > { %s952_s8 = smov 16  }
 0x17c   : > { %656 = dma.vmem_to_hbm [thread:$0]  (%p1260_p6), %s1178_s25, 512, %s1183_s23, %s471_s15, %s950_s30, %s951_s7, %s952_s8  }
 0x17d PF: > { %s502_s27 = sand.u32 1, %s918_s12   ;;  %p1261_p0 = scmp.ne.s32.totalorder %s1250_s4, 0 }
 0x17e   : > { %p1262_p9 = scmp.ge.s32.totalorder %s938_s17, 2  ;;  %s503_s22 = scalar_lea.sflag [#allocation4], %s502_s27 }
 0x180   : > { %p670_p5 = pnand %p1262_p9, %p1261_p0 }
 0x182   : > { %913 = dma.done.wait (!%p670_p5), %s503_s22, 512  }
 0x183   : > { %915 = vsyncadd (!%p670_p5), %s503_s22, 4294966784  ;;  %s20_s17 = sadd.s32 1, %s938_s17   ;;  %s1263_s28 = sld [smem:[#allocation12_spill]] }
 0x184   : > { %p17_p8 = scmp.ge.s32.totalorder %s20_s17, 4   ;;  %s1264_s12 = smov %s922_s13 }
 0x185   : > { %s1265_s13 = smov %s926_s14  ;;  %s1266_s14 = smov %s1021_s24 }
 0x186   : > { %s1267_s15 = smov %s934_s16  ;;  %19 = sbr.rel (!%p17_p8) target bundleno = 9 (0x9), region = 94 }
 0x189   : > { %s1268_s16 = smov %s1263_s28 }
 0x18d   :  { %508 = vsyncpa [#allocation3], 1 }
 0x18e   :  { %510 = vsyncpa [#allocation3 + $0x1], 1 }
 0x18f   :  { %511 = vsyncpa [#allocation6], 1 }
 0x190   :  { %513 = vsyncpa [#allocation6 + $0x1], 1 }
 0x191   :  { %514 = vsyncpa [#allocation4], 1 }
 0x192   :  { %516 = vsyncpa [#allocation4 + $0x1], 1 }

</bundles_post_ra>
